<compile_context>
chip_gen: v6e
topology: v6e:2x2x1
jax: 0.10.0
libtpu: 0.0.40
codegen_flags: <defaults>
</compile_context>

<pallas_src>
import numpy as np
import jax
import jax.numpy as jnp
from jax.experimental import pallas as pl
from jax.experimental.pallas import tpu as pltpu

# Small test shapes consistent with the module (the module itself uses
# N=16, C=480, H=W=16; kernel 2, stride 2).
N, C, H, W = 4, 64, 16, 16
KH = KW = 2
KHW = KH * KW

# Per-grid-step input-block byte budget. The pipeline double-buffers the
# block, so VMEM cost is ~2x this; 8 MiB keeps a full-batch single step at the
# module's real shapes (16*480*256 f32 = 7.5 MiB) while staying well inside
# the 32 MiB scoped-VMEM limit requested below.
_BLOCK_BYTE_BUDGET = 8 * 1024 * 1024
_VMEM_LIMIT_BYTES = 32 * 1024 * 1024


def _kernel(b_ref, x_ref, w_ref, o_ref):
    # b_ref: SMEM (1,)          bias scalar
    # x_ref: VMEM (nb, C, HW)   batch chunk in native NCHW layout (HW on lanes)
    # w_ref: VMEM (4, C)        conv-transpose weight, taps x channels
    # o_ref: VMEM (1, nb, 1)    per-sample means for this chunk
    x = x_ref[...]                          # (nb, C, HW)
    w = w_ref[...]                          # (4, C)
    nb, c, hw = x.shape
    khw = w.shape[0]

    # Batched MXU contraction: (nb,4,C) x (nb,C,HW) -> (nb,4,HW), lane-dense.
    # (The weight broadcast is ~1.6% of the x block; compute is idle slack
    #  under the HBM DMA, so we keep this proven lowering.)
    w_b = jnp.broadcast_to(w[None], (nb, khw, c))
    z = jnp.einsum('nkc,nch->nkh', w_b, x,
                   preferred_element_type=jnp.float32)       # (nb, 4, HW)
    z = z + b_ref[0]                                          # bias before activation
    y = jnp.where(z > 0, z, z * 0.5)                          # torch.where(x2>0, x2, 0.5*x2)

    # Lane reduce over HW, then the tiny 4-wide reduce (no relayout anywhere;
    # both are hidden under the x DMA).
    s1 = jnp.sum(y, axis=-1)                                  # (nb, 4)
    s2 = jnp.sum(s1, axis=-1, keepdims=True)                  # (nb, 1)
    o_ref[...] = (s2 * (1.0 / (khw * hw)))[None]              # mean over (2H)*(2W) pixels


def _tensorcores_per_chip():
    """1 on v5e/v6e, 2 on v7x (detection is best-effort and lowering-safe)."""
    try:
        d = jax.devices()[0]
        if d.platform != "tpu":
            return 1
        kind = d.device_kind.lower()
    except Exception:
        return 1
    if "v7" in kind or "tpu7" in kind or "7x" in kind:
        return 2
    return 1


def _pick_num_blocks(n, per_sample_bytes, cores):
    """Smallest divisor of n satisfying both the core split and the VMEM cap."""
    nb_cap = max(1, _BLOCK_BYTE_BUDGET // per_sample_bytes)
    min_blocks = max(cores, -(-n // nb_cap))      # ceil(n / nb_cap)
    for d in range(min_blocks, n + 1):
        if n % d == 0:
            return d
    return n


def model_forward(x, weight, bias):
    """x: (N, C, H, W) float32 (NCHW). Returns (1, N) float32."""
    n, c, h, w = x.shape
    hw = h * w

    # Free reshape: HW is already contiguous in NCHW. No input transpose.
    x_mat = x.reshape(n, c, hw)                               # (N, C, HW)
    # Tiny wrapper-side weight transpose: (C, 1, 2, 2) -> (4, C).
    w_mat = jnp.transpose(weight.reshape(c, KHW)).astype(jnp.float32)
    b = bias.astype(jnp.float32)                              # (1,)

    cores = _tensorcores_per_chip()
    num_blocks = _pick_num_blocks(n, c * hw * 4, cores)
    nb = n // num_blocks

    # Grid semantics: only ask for per-TensorCore sharding when the chip has
    # >1 TC; single-TC chips (or a pure VMEM-cap split) just run serially.
    if num_blocks > 1 and cores >= 2:
        primary_sem = (getattr(pltpu, "CORE_PARALLEL", pltpu.PARALLEL),)
    else:
        primary_sem = (pltpu.ARBITRARY,)
    fallback_sem = (pltpu.ARBITRARY,)

    cost = pl.CostEstimate(
        flops=2 * n * KHW * c * hw + 4 * n * KHW * hw,
        transcendentals=0,
        bytes_accessed=x_mat.size * 4 + w_mat.size * 4 + b.size * 4 + n * 4,
    )

    def build(sem):
        return pl.pallas_call(
            _kernel,
            out_shape=jax.ShapeDtypeStruct((num_blocks, nb, 1), jnp.float32),
            grid_spec=pltpu.PrefetchScalarGridSpec(
                num_scalar_prefetch=0,
                grid=(num_blocks,),
                in_specs=[
                    pl.BlockSpec(memory_space=pltpu.SMEM),            # bias scalar
                    pl.BlockSpec((nb, c, hw), lambda i: (i, 0, 0)),   # batch chunk
                    pl.BlockSpec((KHW, c), lambda i: (0, 0)),         # weight, resident
                ],
                out_specs=pl.BlockSpec((1, nb, 1), lambda i: (i, 0, 0)),
            ),
            compiler_params=pltpu.CompilerParams(
                dimension_semantics=sem,
                vmem_limit_bytes=_VMEM_LIMIT_BYTES),
            cost_estimate=cost,
        )

    if primary_sem == fallback_sem:
        out = build(primary_sem)(b, x_mat, w_mat)
    else:
        try:
            out = build(primary_sem)(b, x_mat, w_mat)
        except Exception:
            # CORE_PARALLEL not accepted on this chip/runtime: serial grid.
            out = build(fallback_sem)(b, x_mat, w_mat)

    return out.reshape(1, n)


def reference(x, weight, bias):
    """Pure-JAX reference mirroring the PyTorch module."""
    # conv_transpose (kernel=stride=2):
    #   out[n,2h+kh,2w+kw] = sum_c x[n,c,h,w]*W[c,0,kh,kw] + b
    z = jnp.einsum('nchw,ckl->nhwkl', x, weight[:, 0]) + bias[0]
    y = jnp.where(z > 0, z, z * 0.5)
    m = jnp.mean(y, axis=(1, 2, 3, 4))                        # adaptive_avg_pool2d((1,1))
    return m.reshape(1, -1)


if __name__ == "__main__":
    key = jax.random.PRNGKey(0)
    kx, kw_, kb = jax.random.split(key, 3)

    x = jax.random.normal(kx, (N, C, H, W), dtype=jnp.float32)

    # Deterministic parameter init (shapes match ConvTranspose2d(C, 1, 2, stride=2)):
    # weight (in_channels, out_channels, kH, kW) = (C, 1, 2, 2), bias (1,)
    bound = 1.0 / np.sqrt(C * KH * KW)
    weight = jax.random.uniform(kw_, (C, 1, KH, KW), jnp.float32, -bound, bound)
    bias = jax.random.uniform(kb, (1,), jnp.float32, -bound, bound)

    out = jax.block_until_ready(model_forward(x, weight, bias))
    ref = jax.block_until_ready(reference(x, weight, bias))

    assert out.shape == (1, N), out.shape
    np.testing.assert_allclose(np.asarray(out), np.asarray(ref), rtol=1e-5, atol=1e-5)
    print("KERNEL_OK")
</pallas_src>

<mosaic_0001>
module attributes {stable_mosaic.version = 11 : i64} {
  func.func @_kernel(%arg0: i32, %arg1: memref<1xf32, #tpu.memory_space<smem>>, %arg2: memref<4x64x256xf32, #tpu.memory_space<vmem>>, %arg3: memref<4x64xf32, #tpu.memory_space<vmem>>, %arg4: memref<1x4x1xf32, #tpu.memory_space<vmem>>) attributes {dimension_semantics = [#tpu.dimension_semantics<arbitrary>], iteration_bounds = array<i64: 1>, scalar_prefetch = 0 : i64, scratch_operands = 0 : i64, tpu.core_type = #tpu.core_type<tc>, window_params = [{transform_indices = @transform_0, window_bounds = array<i64: 1>}, {transform_indices = @transform_1, window_bounds = array<i64: 4, 64, 256>}, {pipeline_mode = #tpu.pipeline_mode<synchronous>, transform_indices = @transform_2, window_bounds = array<i64: 4, 64>}, {transform_indices = @transform_3, window_bounds = array<i64: 1, 4, 1>}]} {
    %c0 = arith.constant 0 : index
    %c0_0 = arith.constant 0 : index
    %c0_1 = arith.constant 0 : index
    %0 = vector.load %arg2[%c0, %c0_0, %c0_1] : memref<4x64x256xf32, #tpu.memory_space<vmem>>, vector<4x64x256xf32>
    %c0_2 = arith.constant 0 : index
    %c0_3 = arith.constant 0 : index
    %1 = vector.load %arg3[%c0_2, %c0_3] : memref<4x64xf32, #tpu.memory_space<vmem>>, vector<4x64xf32>
    %2 = vector.shape_cast %1 : vector<4x64xf32> to vector<1x4x64xf32>
    %3 = vector.shape_cast %2 : vector<1x4x64xf32> to vector<1x4x64xf32>
    %4 = vector.broadcast %3 : vector<1x4x64xf32> to vector<4x4x64xf32>
    "tpu.trace_start"() <{level = 10 : i32, message = "nkc,nch->nkh"}> : () -> ()
    %cst = arith.constant dense<0.000000e+00> : vector<4x4x256xf32>
    %5 = tpu.matmul %4, %0, %cst {dimension_numbers = #tpu.dot_dimension_numbers<[2], [1], [1], [2], [0, 0, 0, 1, 1, 2], [0], [0]>} : vector<4x4x64xf32>, vector<4x64x256xf32>, vector<4x4x256xf32> -> vector<4x4x256xf32>
    "tpu.trace_stop"() : () -> ()
    %c0_4 = arith.constant 0 : index
    %6 = memref.load %arg1[%c0_4] : memref<1xf32, #tpu.memory_space<smem>>
    %7 = vector.broadcast %6 : f32 to vector<4x4x256xf32>
    %8 = arith.addf %5, %7 : vector<4x4x256xf32>
    %cst_5 = arith.constant 0.000000e+00 : f32
    %9 = vector.broadcast %cst_5 : f32 to vector<4x4x256xf32>
    %10 = arith.cmpf ogt, %8, %9 : vector<4x4x256xf32>
    %cst_6 = arith.constant 5.000000e-01 : f32
    %11 = vector.broadcast %cst_6 : f32 to vector<4x4x256xf32>
    %12 = arith.mulf %8, %11 : vector<4x4x256xf32>
    %13 = arith.select %10, %8, %12 : vector<4x4x256xi1>, vector<4x4x256xf32>
    %cst_7 = arith.constant dense<0.000000e+00> : vector<4x4xf32>
    %14 = vector.multi_reduction <add>, %13, %cst_7 [2] : vector<4x4x256xf32> to vector<4x4xf32>
    %cst_8 = arith.constant dense<0.000000e+00> : vector<4xf32>
    %15 = vector.multi_reduction <add>, %14, %cst_8 [1] : vector<4x4xf32> to vector<4xf32>
    %16 = vector.shape_cast %15 : vector<4xf32> to vector<4x1xf32>
    %cst_9 = arith.constant 9.765625E-4 : f32
    %17 = vector.broadcast %cst_9 : f32 to vector<4x1xf32>
    %18 = arith.mulf %16, %17 : vector<4x1xf32>
    %19 = vector.shape_cast %18 : vector<4x1xf32> to vector<1x4x1xf32>
    %c0_10 = arith.constant 0 : index
    %c0_11 = arith.constant 0 : index
    %c0_12 = arith.constant 0 : index
    %20 = vector.load %arg4[%c0_10, %c0_11, %c0_12] : memref<1x4x1xf32, #tpu.memory_space<vmem>>, vector<1x4x1xf32>
    tpu.vector_store %arg4[%c0_10, %c0_11, %c0_12], %19 {strides = array<i32>} : memref<1x4x1xf32, #tpu.memory_space<vmem>>, vector<1x4x1xf32>,
    return
  }
  func.func @transform_0(%arg0: i32) -> i32 {
    %c0_i32 = arith.constant 0 : i32
    %c0_i32_0 = arith.constant 0 : i32
    return %c0_i32 : i32
  }
  func.func @transform_1(%arg0: i32) -> (i32, i32, i32) {
    %c0_i32 = arith.constant 0 : i32
    %c0_i32_0 = arith.constant 0 : i32
    %c0_i32_1 = arith.constant 0 : i32
    return %arg0, %c0_i32, %c0_i32_0 : i32, i32, i32
  }
  func.func @transform_2(%arg0: i32) -> (i32, i32) {
    %c0_i32 = arith.constant 0 : i32
    %c0_i32_0 = arith.constant 0 : i32
    %c0_i32_1 = arith.constant 0 : i32
    return %c0_i32, %c0_i32_0 : i32, i32
  }
  func.func @transform_3(%arg0: i32) -> (i32, i32, i32) {
    %c0_i32 = arith.constant 0 : i32
    %c0_i32_0 = arith.constant 0 : i32
    %c0_i32_1 = arith.constant 0 : i32
    return %arg0, %c0_i32, %c0_i32_0 : i32, i32, i32
  }
}

</mosaic_0001>

<bundles_post_ra>
// kernel: tpu_custom_call.1
= control target key start
LH: loop header
LB: loop body
LE: loop exit
PB: predicated region body
PF: predicated region fallthrough
CT: control target
= control target key end

     0   :  { %9 = vsyncpa [#allocation4], 0  ;;  %s595_s0 = inlined_call_operand.<no memory space> [shape: f32[1], index: 0, kind: input, shape index: {}]   ;;  %s596_s1 = inlined_call_operand.hbm [shape: f32[4,64,256], index: 1, kind: input, shape index: {}]   ;;  %s597_s2 = inlined_call_operand.hbm [shape: f32[4,64], index: 2, kind: input, shape index: {}]   ;;  %s598_s3 = inlined_call_operand.vmem [shape: f32[1,4,1], index: 3, kind: output, shape index: {}]  }
   0x1   :  { %10 = vsyncpa [#allocation6], 0  ;;  %s536_s12 = smov [#allocation3]  }
   0x2   :  { %s18_s13 = sshll.u32 %s536_s12, 4  ;;  %s19_s13 = int_to_ptr.vmem [resolvable:$true] %s18_s13 }
   0x3   :  { %s500_s14 = scalar_lea.vmem %s19_s13, 8192  ;;  %p505_p1 = scmp.lt.s32.totalorder %s19_s13, %s19_s13 }
   0x4   :  { %p501_p0 = scmp.ne.s32.totalorder %s19_s13, %s500_s14  ;;  %p506_p2 = scmp.lt.s32.totalorder %s500_s14, %s500_s14 }
   0x6   :  { %p507_p3 = por %p506_p2, %p505_p1 }
   0x8   :  { %p508_p4 = pnand %p507_p3, %p501_p0 }
   0xa   :  { %511 = shalt.err (!%p508_p4)
}
   0xb   :  { %s537_s15 = smov 256   ;;  %s538_s16 = smov 16  }
   0xc   :  { %24 = dma.hbm_to_vmem [thread:$0]  %s596_s1, 8192, %s19_s13, [#allocation4], %s537_s15, %s537_s15, %s538_s16  }
   0xd   :  { %s539_s19 = smov [#allocation5]  }
   0xe   :  { %s31_s20 = sshll.u32 %s539_s19, 4  ;;  %s32_s20 = int_to_ptr.vmem [resolvable:$true] %s31_s20 }
   0xf   :  { %s520_s21 = scalar_lea.vmem %s32_s20, 64  ;;  %p525_p6 = scmp.lt.s32.totalorder %s32_s20, %s32_s20 }
  0x10   :  { %p521_p5 = scmp.ne.s32.totalorder %s32_s20, %s520_s21  ;;  %p526_p7 = scmp.lt.s32.totalorder %s520_s21, %s520_s21 }
  0x12   :  { %p527_p8 = por %p526_p7, %p525_p6 }
  0x14   :  { %p528_p9 = pnand %p527_p8, %p521_p5 }
  0x16   :  { %531 = shalt.err (!%p528_p9)
}
  0x17   :  { %34 = dma.hbm_to_vmem [thread:$0]  %s597_s2, 64, %s32_s20, [#allocation6]  }
  0x18   :  { %532 = dma.done.wait [#allocation4], 8192  }
  0x19   :  { %533 = vsyncadd [#allocation4], 4294959104 }
  0x1a   :  { %534 = dma.done.wait [#allocation6], 64  }
  0x1b   :  { %535 = vsyncadd [#allocation6], 4294967232  ;;  %v540_v0 = vmov 0.0   ;;  %v56_v1 = vld [vmem:[#allocation3 + $0x78] sm:$0xff]  ;;  %v55_v3 = vld [vmem:[#allocation3 + $0x70] sm:$0xff]  ;;  %vm108_vm0 = vcmask 523264  }
  0x1c   :  { %176 = vmatprep.mubr.f32.mxu0 %v540_v0  ;;  %247 = vmatprep.mubr.f32.mxu1 %v540_v0  ;;  %v72_v2 = vld [vmem:[#allocation3 + $0xf8] sm:$0xff]  ;;  %v71_v4 = vld [vmem:[#allocation3 + $0xf0] sm:$0xff]  ;;  %v54_v5 = vld [vmem:[#allocation3 + $0x68] sm:$0xff]  ;;  %vm420_vm4 = vcmask 1043456   ;;  %vm463_vm10 = vcmask 1041409   ;;  %vm465_vm11 = vcmask 1042434  }
  0x1d   :  { %128 = vmatprep.subr.mxu0 %v56_v1  ;;  %199 = vmatprep.subr.mxu1 %v72_v2  ;;  %v70_v6 = vld [vmem:[#allocation3 + $0xe8] sm:$0xff]  ;;  %v53_v7 = vld [vmem:[#allocation3 + $0x60] sm:$0xff]  ;;  %v52_v9 = vld [vmem:[#allocation3 + $0x58] sm:$0xff]  ;;  %vm467_vm12 = vcmask 1043459   ;;  %vm470_vm13 = vcmask 27648   ;;  %vm475_vm14 = vcmask 3072  }
  0x1e   :  { %129 = vmatpush1.msra.mxu0 %v55_v3  ;;  %200 = vmatpush1.msra.mxu1 %v71_v4  ;;  %v69_v8 = vld [vmem:[#allocation3 + $0xe0] sm:$0xff]  ;;  %v68_v10 = vld [vmem:[#allocation3 + $0xd8] sm:$0xff]  ;;  %v51_v11 = vld [vmem:[#allocation3 + $0x50] sm:$0xff]  ;;  %v107_v3 = vstv %s595_s0 }
  0x1f   :  { %130 = vmatprep.subr.mxu0 %v54_v5  ;;  %201 = vmatprep.subr.mxu1 %v70_v6  ;;  %v67_v12 = vld [vmem:[#allocation3 + $0xd0] sm:$0xff]  ;;  %v50_v13 = vld [vmem:[#allocation3 + $0x48] sm:$0xff]  ;;  %v49_v15 = vld [vmem:[#allocation3 + $0x40] sm:$0xff] }
  0x20   :  { %131 = vmatpush1.msra.mxu0 %v53_v7  ;;  %202 = vmatpush1.msra.mxu1 %v69_v8  ;;  %v66_v14 = vld [vmem:[#allocation3 + $0xc8] sm:$0xff]  ;;  %v65_v16 = vld [vmem:[#allocation3 + $0xc0] sm:$0xff]  ;;  %v48_v17 = vld [vmem:[#allocation3 + $0x38] sm:$0xff] }
  0x21   :  { %132 = vmatprep.subr.mxu0 %v52_v9  ;;  %203 = vmatprep.subr.mxu1 %v68_v10  ;;  %v64_v18 = vld [vmem:[#allocation3 + $0xb8] sm:$0xff]  ;;  %v47_v19 = vld [vmem:[#allocation3 + $0x30] sm:$0xff]  ;;  %v46_v21 = vld [vmem:[#allocation3 + $0x28] sm:$0xff] }
  0x22   :  { %133 = vmatpush1.msra.mxu0 %v51_v11  ;;  %204 = vmatpush1.msra.mxu1 %v67_v12  ;;  %v63_v20 = vld [vmem:[#allocation3 + $0xb0] sm:$0xff]  ;;  %v62_v22 = vld [vmem:[#allocation3 + $0xa8] sm:$0xff]  ;;  %v45_v23 = vld [vmem:[#allocation3 + $0x20] sm:$0xff] }
  0x23   :  { %134 = vmatprep.subr.mxu0 %v50_v13  ;;  %205 = vmatprep.subr.mxu1 %v66_v14  ;;  %v61_v24 = vld [vmem:[#allocation3 + $0xa0] sm:$0xff]  ;;  %v44_v25 = vld [vmem:[#allocation3 + $0x18] sm:$0xff]  ;;  %v43_v27 = vld [vmem:[#allocation3 + $0x10] sm:$0xff] }
  0x24   :  { %135 = vmatpush1.msra.mxu0 %v49_v15  ;;  %206 = vmatpush1.msra.mxu1 %v65_v16  ;;  %v60_v26 = vld [vmem:[#allocation3 + $0x98] sm:$0xff]  ;;  %v59_v28 = vld [vmem:[#allocation3 + $0x90] sm:$0xff]  ;;  %v42_v29 = vld [vmem:[#allocation3 + $0x8] sm:$0xff] }
  0x25   :  { %136 = vmatprep.subr.mxu0 %v48_v17  ;;  %207 = vmatprep.subr.mxu1 %v64_v18  ;;  %v58_v30 = vld [vmem:[#allocation3 + $0x88] sm:$0xff]  ;;  %v41_v31 = vld [vmem:[#allocation3] sm:$0xff]  ;;  %v88_v34 = vld [vmem:[#allocation3 + $0x178] sm:$0xff] }
  0x26   :  { %137 = vmatpush1.msra.mxu0 %v47_v19  ;;  %208 = vmatpush1.msra.mxu1 %v63_v20  ;;  %v57_v32 = vld [vmem:[#allocation3 + $0x80] sm:$0xff]  ;;  %v104_v35 = vld [vmem:[#allocation3 + $0x1f8] sm:$0xff]  ;;  %v87_v36 = vld [vmem:[#allocation3 + $0x170] sm:$0xff] }
  0x27   :  { %138 = vmatprep.subr.mxu0 %v46_v21  ;;  %209 = vmatprep.subr.mxu1 %v62_v22  ;;  %v569_v33 = vld [vmem:[#allocation5] sm:$0xf]  ;;  %v103_v37 = vld [vmem:[#allocation3 + $0x1f0] sm:$0xff]  ;;  %v86_v38 = vld [vmem:[#allocation3 + $0x168] sm:$0xff] }
  0x28   :  { %139 = vmatpush1.msra.mxu0 %v45_v23  ;;  %210 = vmatpush1.msra.mxu1 %v61_v24  ;;  %v102_v39 = vld [vmem:[#allocation3 + $0x1e8] sm:$0xff]  ;;  %v85_v40 = vld [vmem:[#allocation3 + $0x160] sm:$0xff]  ;;  %v84_v42 = vld [vmem:[#allocation3 + $0x158] sm:$0xff] }
  0x29   :  { %140 = vmatprep.subr.mxu0 %v44_v25  ;;  %211 = vmatprep.subr.mxu1 %v60_v26  ;;  %v101_v41 = vld [vmem:[#allocation3 + $0x1e0] sm:$0xff]  ;;  %v100_v43 = vld [vmem:[#allocation3 + $0x1d8] sm:$0xff]  ;;  %v83_v44 = vld [vmem:[#allocation3 + $0x150] sm:$0xff] }
  0x2a   :  { %141 = vmatpush1.msra.mxu0 %v43_v27  ;;  %212 = vmatpush1.msra.mxu1 %v59_v28  ;;  %v99_v45 = vld [vmem:[#allocation3 + $0x1d0] sm:$0xff]  ;;  %v82_v46 = vld [vmem:[#allocation3 + $0x148] sm:$0xff]  ;;  %v81_v48 = vld [vmem:[#allocation3 + $0x140] sm:$0xff] }
  0x2b   :  { %142 = vmatprep.subr.mxu0 %v42_v29  ;;  %213 = vmatprep.subr.mxu1 %v58_v30  ;;  %v98_v47 = vld [vmem:[#allocation3 + $0x1c8] sm:$0xff]  ;;  %v97_v49 = vld [vmem:[#allocation3 + $0x1c0] sm:$0xff]  ;;  %v80_v50 = vld [vmem:[#allocation3 + $0x138] sm:$0xff] }
  0x2c   :  { %143 = vmatpush1.msra.mxu0 %v41_v31  ;;  %214 = vmatpush1.msra.mxu1 %v57_v32  ;;  %v96_v51 = vld [vmem:[#allocation3 + $0x1b8] sm:$0xff]  ;;  %v79_v52 = vld [vmem:[#allocation3 + $0x130] sm:$0xff]  ;;  %v78_v54 = vld [vmem:[#allocation3 + $0x128] sm:$0xff] }
  0x2d   :  { %483 = vmatmul.mubr.msk.f32.vlgmr.msra.gmra.mxu0 %vm108_vm0, %v569_v33  ;;  %270 = vmatprep.subr.mxu0 %v88_v34  ;;  %v95_v53 = vld [vmem:[#allocation3 + $0x1b0] sm:$0xff]  ;;  %v94_v55 = vld [vmem:[#allocation3 + $0x1a8] sm:$0xff]  ;;  %v77_v56 = vld [vmem:[#allocation3 + $0x120] sm:$0xff] }
  0x2e   :  { %341 = vmatprep.subr.mxu1 %v104_v35  ;;  %484 = vmatmul.mubr.msk.f32.vlgmr.msra.gmra.mxu1 %vm108_vm0, %v569_v33  ;;  %v93_v57 = vld [vmem:[#allocation3 + $0x1a0] sm:$0xff]  ;;  %v76_v58 = vld [vmem:[#allocation3 + $0x118] sm:$0xff]  ;;  %v75_v60 = vld [vmem:[#allocation3 + $0x110] sm:$0xff] }
  0x2f   :  { %271 = vmatpush1.msra.mxu0 %v87_v36  ;;  %342 = vmatpush1.msra.mxu1 %v103_v37  ;;  %v92_v59 = vld [vmem:[#allocation3 + $0x198] sm:$0xff]  ;;  %v91_v61 = vld [vmem:[#allocation3 + $0x190] sm:$0xff]  ;;  %v74_v62 = vld [vmem:[#allocation3 + $0x108] sm:$0xff] }
  0x30   :  { %272 = vmatprep.subr.mxu0 %v86_v38  ;;  %343 = vmatprep.subr.mxu1 %v102_v39  ;;  %v90_v63 = vld [vmem:[#allocation3 + $0x188] sm:$0xff]  ;;  %v73_v1 = vld [vmem:[#allocation3 + $0x100] sm:$0xff] }
  0x31   :  { %273 = vmatpush1.msra.mxu0 %v85_v40  ;;  %344 = vmatpush1.msra.mxu1 %v101_v41  ;;  %v89_v2 = vld [vmem:[#allocation3 + $0x180] sm:$0xff] }
  0x32   :  { %274 = vmatprep.subr.mxu0 %v84_v42  ;;  %345 = vmatprep.subr.mxu1 %v100_v43 }
  0x33   :  { %275 = vmatpush1.msra.mxu0 %v83_v44  ;;  %346 = vmatpush1.msra.mxu1 %v99_v45 }
  0x34   :  { %276 = vmatprep.subr.mxu0 %v82_v46  ;;  %347 = vmatprep.subr.mxu1 %v98_v47  ;;  %v445_v47 = vlaneseq }
  0x35   :  { %277 = vmatpush1.msra.mxu0 %v81_v48  ;;  %348 = vmatpush1.msra.mxu1 %v97_v49 }
  0x36   :  { %278 = vmatprep.subr.mxu0 %v80_v50  ;;  %349 = vmatprep.subr.mxu1 %v96_v51  ;;  %v446_v49 = vand.u32 127, %v445_v47  ;;  %v448_v50 = vshrl.u32 %v445_v47, 7 }
  0x37   :  { %279 = vmatpush1.msra.mxu0 %v79_v52  ;;  %350 = vmatpush1.msra.mxu1 %v95_v53 }
  0x38   :  { %280 = vmatprep.subr.mxu0 %v78_v54  ;;  %351 = vmatprep.subr.mxu1 %v94_v55  ;;  %v449_v52 = vsub.s32 %v446_v49, %v448_v50 }
  0x39   :  { %281 = vmatpush1.msra.mxu0 %v77_v56  ;;  %352 = vmatpush1.msra.mxu1 %v93_v57 }
  0x3a   :  { %282 = vmatprep.subr.mxu0 %v76_v58  ;;  %353 = vmatprep.subr.mxu1 %v92_v59 }
  0x3b   :  { %283 = vmatpush1.msra.mxu0 %v75_v60  ;;  %354 = vmatpush1.msra.mxu1 %v91_v61 }
  0x3c   :  { %284 = vmatprep.subr.mxu0 %v74_v62  ;;  %355 = vmatprep.subr.mxu1 %v90_v63 }
  0x3d   :  { %285 = vmatpush1.msra.mxu0 %v73_v1  ;;  %318 = vmatprep.mubr.f32.mxu0 %v540_v0 }
  0x3e   :  { %356 = vmatpush1.msra.mxu1 %v89_v2  ;;  %389 = vmatprep.mubr.f32.mxu1 %v540_v0 }
  0x3f   :  { %485 = vmatmul.mubr.msk.f32.vlgmr.msra.gmra.mxu0 %vm108_vm0, %v569_v33  ;;  %486 = vmatmul.mubr.msk.f32.vlgmr.msra.gmra.mxu1 %vm108_vm0, %v569_v33 }
  0xed   :  { %v178_v4 = vpop.f32.mrf.mxu0 }
  0xee   :  { %v179_v5 = vadd.f32 %v178_v4, %v107_v3  ;;  %v249_v6 = vpop.f32.mrf.mxu1 }
  0xef   :  { %v250_v7 = vadd.f32 %v249_v6, %v107_v3  ;;  %v180_v8 = vpop.f32.mrf.mxu0 }
  0xf0   :  { %v404_v9 = vmul.f32 0.5, %v179_v5  ;;  %v181_v10 = vadd.f32 %v180_v8, %v107_v3  ;;  %v251_v11 = vpop.f32.mrf.mxu1  ;;  %vm396_vm1 = vcmp.gt.f32.partialorder %v179_v5, 0.0 }
  0xf1   :  { %vm398_vm2 = vcmp.gt.f32.partialorder %v250_v7, 0.0  ;;  %v406_v0 = vmul.f32 0.5, %v250_v7  ;;  %v252_v12 = vadd.f32 %v251_v11, %v107_v3 }
  0xf2   :  { %v405_v13 = vmul.f32 0.5, %v181_v10  ;;  %vm397_vm3 = vcmp.gt.f32.partialorder %v181_v10, 0.0  ;;  %v412_v14 = vsel %vm396_vm1, %v179_v5, %v404_v9 }
  0xf3   :  { %vm399_vm5 = vcmp.gt.f32.partialorder %v252_v12, 0.0  ;;  %v407_v15 = vmul.f32 0.5, %v252_v12  ;;  %v414_v17 = vsel %vm398_vm2, %v250_v7, %v406_v0  ;;  %v421_v18 = vsel %vm420_vm4, %v412_v14, 0.0 }
  0xf4   :  { %v413_v16 = vsel %vm397_vm3, %v181_v10, %v405_v13  ;;  %v426_v22 = vsel %vm420_vm4, %v414_v17, 0.0 }
  0xf5   :  { %v422_v19 = vsel %vm420_vm4, %v413_v16, 0.0  ;;  %v415_v20 = vsel %vm399_vm5, %v252_v12, %v407_v15 }
  0xf6   :  { %v423_v21 = vadd.f32 %v422_v19, %v421_v18  ;;  %v427_v23 = vsel %vm420_vm4, %v415_v20, 0.0 }
  0xf7   :  { %v428_v24 = vadd.f32 %v427_v23, %v426_v22 }
  0xf8   :  { %424 = vadd.xlane.f32.xlu0 %v423_v21 }
  0xfc   :  { %429 = vadd.xlane.f32.xlu0 %v428_v24 }
  0xff   :  { %v320_v25 = vpop.f32.mrf.mxu0  ;;  %v391_v26 = vpop.f32.mrf.mxu1 }
 0x100   :  { %v321_v27 = vadd.f32 %v320_v25, %v107_v3  ;;  %v392_v28 = vadd.f32 %v391_v26, %v107_v3 }
 0x101   :  { %v322_v29 = vpop.f32.mrf.mxu0  ;;  %v393_v30 = vpop.f32.mrf.mxu1 }
 0x102   :  { %v408_v31 = vmul.f32 0.5, %v321_v27  ;;  %v410_v32 = vmul.f32 0.5, %v392_v28  ;;  %v323_v33 = vadd.f32 %v322_v29, %v107_v3  ;;  %vm402_vm6 = vcmp.gt.f32.partialorder %v392_v28, 0.0 }
 0x103   :  { %v394_v34 = vadd.f32 %v393_v30, %v107_v3  ;;  %vm400_vm7 = vcmp.gt.f32.partialorder %v321_v27, 0.0 }
 0x104   :  { %v409_v35 = vmul.f32 0.5, %v323_v33  ;;  %vm401_vm8 = vcmp.gt.f32.partialorder %v323_v33, 0.0  ;;  %v416_v36 = vsel %vm400_vm7, %v321_v27, %v408_v31  ;;  %v418_v39 = vsel %vm402_vm6, %v392_v28, %v410_v32 }
 0x105   :  { %vm403_vm9 = vcmp.gt.f32.partialorder %v394_v34, 0.0  ;;  %v411_v37 = vmul.f32 0.5, %v394_v34  ;;  %v431_v40 = vsel %vm420_vm4, %v416_v36, 0.0  ;;  %v436_v44 = vsel %vm420_vm4, %v418_v39, 0.0 }
 0x106   :  { %v417_v38 = vsel %vm401_vm8, %v323_v33, %v409_v35 }
 0x107   :  { %v432_v41 = vsel %vm420_vm4, %v417_v38, 0.0  ;;  %v419_v42 = vsel %vm403_vm9, %v394_v34, %v411_v37 }
 0x108   :  { %v433_v43 = vadd.f32 %v432_v41, %v431_v40  ;;  %v437_v45 = vsel %vm420_vm4, %v419_v42, 0.0 }
 0x109   :  { %v438_v46 = vadd.f32 %v437_v45, %v436_v44 }
 0x10a   :  { %434 = vadd.xlane.f32.xlu1 %v433_v43 }
 0x10e   :  { %439 = vadd.xlane.f32.xlu1 %v438_v46 }
 0x181   :  { %v425_v48 = vpop.xlane.xlu0 %424 }
 0x182   :  { %v450_v56 = vrot.slane %v425_v48, %v449_v52 }
 0x185   :  { %v430_v51 = vpop.xlane.xlu0 %429 }
 0x186   :  { %v454_v54 = vrot.slane %v430_v51, %v449_v52 }
 0x188   :  { %v464_v58 = vsel %vm463_vm10, %v454_v54, %v450_v56 }
 0x193   :  { %v435_v53 = vpop.xlane.xlu1 %434 }
 0x194   :  { %v458_v55 = vrot.slane %v435_v53, %v449_v52 }
 0x196   :  { %v466_v60 = vsel %vm465_vm11, %v458_v55, %v464_v58 }
 0x197   :  { %v440_v57 = vpop.xlane.xlu1 %439 }
 0x198   :  { %v462_v59 = vrot.slane %v440_v57, %v449_v52 }
 0x19a   :  { %v468_v61 = vsel %vm467_vm12, %v462_v59, %v466_v60 }
 0x19b   :  { %v471_v62 = vsel %vm470_vm13, %v468_v61, 0.0 }
 0x19c   :  { %472 = vadd.xlane.f32.xlu0 %v471_v62 }
 0x225   :  { %v473_v63 = vpop.xlane.xlu0 %472 }
 0x226   :  { %v474_v1 = vmul.f32 0.0009765625, %v473_v63 }
 0x228   :  { %476 = vst.msk [vmem:[%s598_s3] sm:$0xf] %vm475_vm14, %v474_v1 }
 0x229   :  { %481 = vsyncpa [#allocation4], 1 }
 0x22a   :  { %482 = vsyncpa [#allocation6], 1 }

</bundles_post_ra>
